<compile_context>
chip_gen: v6e
topology: v6e:2x2x1
jax: 0.10.0
libtpu: 0.0.40
codegen_flags: <defaults>
</compile_context>

<pallas_src>
import functools
from typing import NamedTuple

import jax
import jax.numpy as jnp
from jax.experimental import pallas as pl
from jax.experimental.pallas import tpu as pltpu

HIDDEN = 256  # fixed by the module definition (fc1/fc2 -> 256)


def _round_up(n, m):
    return ((n + m - 1) // m) * m


def _cdiv(a, b):
    return -(-a // b)


class PreparedActorParams(NamedTuple):
    w1: jax.Array    # (obs_p, HIDDEN)  bf16
    b12: jax.Array   # (2, HIDDEN)      f32   rows: [b1, b2]
    w2: jax.Array    # (HIDDEN, HIDDEN) bf16
    wmu: jax.Array   # (HIDDEN, act_p)  bf16
    tail: jax.Array  # (3, act_p)       f32   rows: [b_mu, action_scale, action_bias]
    obs_dim: int
    obs_p: int
    act_dim: int
    act_p: int


def _actor_kernel(x_ref, w1_ref, b12_ref, w2_ref, wmu_ref, tail_ref, o_ref, *,
                  act_dim):
    # Entire MLP hot path runs inside the kernel on one batch tile.
    x = x_ref[...].astype(jnp.bfloat16)       # in-kernel cast (VPU slack)
    b12 = b12_ref[...]                        # (2, HIDDEN)  f32
    tail = tail_ref[...]                      # (3, act_p)   f32

    h1 = jnp.dot(x, w1_ref[...],
                 preferred_element_type=jnp.float32) + b12[0:1, :]
    h1 = jnp.maximum(h1, 0.0)                 # relu(fc1), f32

    h2 = jnp.dot(h1.astype(jnp.bfloat16), w2_ref[...],
                 preferred_element_type=jnp.float32) + b12[1:2, :]
    h2 = jnp.maximum(h2, 0.0)                 # relu(fc2), f32

    mu = jnp.dot(h2.astype(jnp.bfloat16), wmu_ref[...],
                 preferred_element_type=jnp.float32) + tail[0:1, :]
    mu = jnp.tanh(mu)                         # tanh(fc_mu), f32

    out = mu * tail[1:2, :] + tail[2:3, :]    # f32 epilogue, [bt, act_p]
    o_ref[...] = out[:, :act_dim]             # store only the real action cols


def prepare_actor_params(params):
    """Pad / cast / pack the Actor params once; reuse across forward calls."""
    w1, b1, w2, b2, wmu, bmu, scale, bias = params
    obs_dim = w1.shape[0]
    act_dim = wmu.shape[1]
    obs_p = _round_up(obs_dim, 128)
    act_p = _round_up(act_dim, 128)

    w1_p = (jnp.zeros((obs_p, HIDDEN), jnp.float32)
            .at[:obs_dim, :].set(w1).astype(jnp.bfloat16))
    w2_b = w2.astype(jnp.bfloat16)
    wmu_p = (jnp.zeros((HIDDEN, act_p), jnp.float32)
             .at[:, :act_dim].set(wmu).astype(jnp.bfloat16))
    b12 = jnp.concatenate([b1, b2], axis=0).astype(jnp.float32)     # (2, HIDDEN)
    tail = (jnp.zeros((3, act_p), jnp.float32)
            .at[0, :act_dim].set(bmu[0])
            .at[1, :act_dim].set(scale[0])
            .at[2, :act_dim].set(bias[0]))
    return PreparedActorParams(w1_p, b12, w2_b, wmu_p, tail,
                               obs_dim, obs_p, act_dim, act_p)


def _choose_batch_tile(B, batch_tile, min_steps):
    """Tile is a multiple of 8, bounded padding waste, >=2 steps when B > 8."""
    batch_tile = max(8, (batch_tile // 8) * 8)          # (8,128) sublane rule
    if B <= 8:
        return 8, 1
    n_steps = max(_cdiv(B, batch_tile), min(min_steps, _cdiv(B, 8)))
    bt = _round_up(_cdiv(B, n_steps), 8)
    return bt, _cdiv(B, bt)


def actor_forward(x, prepared: PreparedActorParams, *,
                  batch_tile=2048, min_grid_steps=2):
    """x: [B, obs_dim] float32.  Returns [B, act_dim] float32."""
    B, obs_dim = x.shape
    assert obs_dim == prepared.obs_dim
    obs_p, act_dim, act_p = prepared.obs_p, prepared.act_dim, prepared.act_p

    bt, n_steps = _choose_batch_tile(B, batch_tile, min_grid_steps)
    B_p = bt * n_steps

    if B_p != B or obs_p != obs_dim:
        x_p = jnp.zeros((B_p, obs_p), jnp.float32).at[:B, :obs_dim].set(x)
    else:
        x_p = x

    # Replicated operands (weights / bias rows): constant block index -> Pallas
    # DMAs them once and skips re-fetch on subsequent grid steps.
    full = lambda i: (0, 0)

    out = pl.pallas_call(
        functools.partial(_actor_kernel, act_dim=act_dim),
        out_shape=jax.ShapeDtypeStruct((B_p, act_dim), jnp.float32),
        grid_spec=pltpu.PrefetchScalarGridSpec(
            num_scalar_prefetch=0,
            grid=(n_steps,),
            in_specs=[
                pl.BlockSpec((bt, obs_p), lambda i: (i, 0)),   # x tile (f32)
                pl.BlockSpec((obs_p, HIDDEN), full),           # w1 (bf16)
                pl.BlockSpec((2, HIDDEN), full),               # [b1; b2] (f32)
                pl.BlockSpec((HIDDEN, HIDDEN), full),          # w2 (bf16)
                pl.BlockSpec((HIDDEN, act_p), full),           # w_mu (bf16)
                pl.BlockSpec((3, act_p), full),                # [b_mu; scale; bias]
            ],
            out_specs=pl.BlockSpec((bt, act_dim), lambda i: (i, 0)),
        ),
        compiler_params=pltpu.CompilerParams(
            dimension_semantics=("parallel",),
            vmem_limit_bytes=32 * 1024 * 1024),
    )(x_p, prepared.w1, prepared.b12, prepared.w2, prepared.wmu, prepared.tail)

    return out if B == B_p else out[:B]


def init_params(key, obs_dim, act_dim):
    """Deterministic synthetic init mimicking nn.Linear's U(-1/sqrt(fan_in), +)."""
    ks = jax.random.split(key, 6)

    def linear(kw, kb, fan_in, fan_out):
        lim = 1.0 / jnp.sqrt(jnp.float32(fan_in))
        w = jax.random.uniform(kw, (fan_in, fan_out), jnp.float32, -lim, lim)
        b = jax.random.uniform(kb, (1, fan_out), jnp.float32, -lim, lim)
        return w, b

    w1, b1 = linear(ks[0], ks[1], obs_dim, HIDDEN)
    w2, b2 = linear(ks[2], ks[3], HIDDEN, HIDDEN)
    wmu, bmu = linear(ks[4], ks[5], HIDDEN, act_dim)

    # Synthetic action limits: lower = -1.5, upper = +2.5 per action dim
    #   -> scale = (upper - lower)/2 = 2.0, bias = (upper + lower)/2 = 0.5
    scale = jnp.full((1, act_dim), 2.0, jnp.float32)
    bias = jnp.full((1, act_dim), 0.5, jnp.float32)
    return (w1, b1, w2, b2, wmu, bmu, scale, bias)


def actor_reference(x, params):
    """f32 reference with matmul operands quantized to bf16 exactly like the kernel."""
    w1, b1, w2, b2, wmu, bmu, scale, bias = params
    q = lambda a: a.astype(jnp.bfloat16).astype(jnp.float32)
    h1 = jax.nn.relu(q(x) @ q(w1) + b1)
    h2 = jax.nn.relu(q(h1) @ q(w2) + b2)
    return jnp.tanh(q(h2) @ q(wmu) + bmu) * scale + bias


if __name__ == "__main__":
    key = jax.random.PRNGKey(0)
    k_x, k_x2, k_p = jax.random.split(key, 3)

    batch, obs_dim, act_dim = 8, 32, 4     # small shapes consistent with the module
    params = init_params(k_p, obs_dim, act_dim)
    prepared = prepare_actor_params(params)

    # Small-batch (single grid step) path.
    x = jax.random.normal(k_x, (batch, obs_dim), jnp.float32)
    out = jax.block_until_ready(actor_forward(x, prepared))
    ref = actor_reference(x, params)
    assert out.shape == (batch, act_dim)
    assert jnp.allclose(out, ref, atol=1e-4, rtol=1e-4)

    # Multi-step grid + padded-batch path (exercises megacore split & padding).
    x2 = jax.random.normal(k_x2, (300, obs_dim), jnp.float32)
    out2 = jax.block_until_ready(actor_forward(x2, prepared))
    ref2 = actor_reference(x2, params)
    assert out2.shape == (300, act_dim)
    assert jnp.allclose(out2, ref2, atol=1e-4, rtol=1e-4)

    print("KERNEL_OK")
</pallas_src>

<mosaic_0001>
module attributes {stable_mosaic.version = 11 : i64} {
  func.func @_actor_kernel(%arg0: i32, %arg1: memref<8x128xf32, #tpu.memory_space<vmem>>, %arg2: memref<128x256xbf16, #tpu.memory_space<vmem>>, %arg3: memref<2x256xf32, #tpu.memory_space<vmem>>, %arg4: memref<256x256xbf16, #tpu.memory_space<vmem>>, %arg5: memref<256x128xbf16, #tpu.memory_space<vmem>>, %arg6: memref<3x128xf32, #tpu.memory_space<vmem>>, %arg7: memref<8x4xf32, #tpu.memory_space<vmem>>) attributes {dimension_semantics = [#tpu.dimension_semantics<parallel>], iteration_bounds = array<i64: 1>, scalar_prefetch = 0 : i64, scratch_operands = 0 : i64, tpu.core_type = #tpu.core_type<tc>, window_params = [{transform_indices = @transform_0, window_bounds = array<i64: 8, 128>}, {pipeline_mode = #tpu.pipeline_mode<synchronous>, transform_indices = @transform_1, window_bounds = array<i64: 128, 256>}, {pipeline_mode = #tpu.pipeline_mode<synchronous>, transform_indices = @transform_2, window_bounds = array<i64: 2, 256>}, {pipeline_mode = #tpu.pipeline_mode<synchronous>, transform_indices = @transform_3, window_bounds = array<i64: 256, 256>}, {pipeline_mode = #tpu.pipeline_mode<synchronous>, transform_indices = @transform_4, window_bounds = array<i64: 256, 128>}, {pipeline_mode = #tpu.pipeline_mode<synchronous>, transform_indices = @transform_5, window_bounds = array<i64: 3, 128>}, {transform_indices = @transform_6, window_bounds = array<i64: 8, 4>}]} {
    %c0 = arith.constant 0 : index
    %c0_0 = arith.constant 0 : index
    %0 = vector.load %arg1[%c0, %c0_0] : memref<8x128xf32, #tpu.memory_space<vmem>>, vector<8x128xf32>
    %1 = arith.truncf %0 : vector<8x128xf32> to vector<8x128xbf16>
    %c0_1 = arith.constant 0 : index
    %c0_2 = arith.constant 0 : index
    %2 = vector.load %arg3[%c0_1, %c0_2] : memref<2x256xf32, #tpu.memory_space<vmem>>, vector<2x256xf32>
    %c0_3 = arith.constant 0 : index
    %c0_4 = arith.constant 0 : index
    %3 = vector.load %arg6[%c0_3, %c0_4] : memref<3x128xf32, #tpu.memory_space<vmem>>, vector<3x128xf32>
    %c0_5 = arith.constant 0 : index
    %c0_6 = arith.constant 0 : index
    %4 = vector.load %arg2[%c0_5, %c0_6] : memref<128x256xbf16, #tpu.memory_space<vmem>>, vector<128x256xbf16>
    %cst = arith.constant dense<0.000000e+00> : vector<8x256xf32>
    %5 = tpu.matmul %1, %4, %cst {dimension_numbers = #tpu.dot_dimension_numbers<[1], [0], [0], [1], [0, 0, 1, 1], [], []>} : vector<8x128xbf16>, vector<128x256xbf16>, vector<8x256xf32> -> vector<8x256xf32>
    %6 = vector.extract_strided_slice %2 {offsets = [0, 0], sizes = [1, 256], strides = [1, 1]} : vector<2x256xf32> to vector<1x256xf32>
    %7 = vector.broadcast %6 : vector<1x256xf32> to vector<8x256xf32>
    %8 = arith.addf %5, %7 : vector<8x256xf32>
    %cst_7 = arith.constant 0.000000e+00 : f32
    %9 = vector.broadcast %cst_7 : f32 to vector<8x256xf32>
    %10 = arith.maximumf %8, %9 : vector<8x256xf32>
    %11 = arith.truncf %10 : vector<8x256xf32> to vector<8x256xbf16>
    %c0_8 = arith.constant 0 : index
    %c0_9 = arith.constant 0 : index
    %12 = vector.load %arg4[%c0_8, %c0_9] : memref<256x256xbf16, #tpu.memory_space<vmem>>, vector<256x256xbf16>
    %cst_10 = arith.constant dense<0.000000e+00> : vector<8x256xf32>
    %13 = tpu.matmul %11, %12, %cst_10 {dimension_numbers = #tpu.dot_dimension_numbers<[1], [0], [0], [1], [0, 0, 1, 1], [], []>} : vector<8x256xbf16>, vector<256x256xbf16>, vector<8x256xf32> -> vector<8x256xf32>
    %14 = vector.extract_strided_slice %2 {offsets = [1, 0], sizes = [1, 256], strides = [1, 1]} : vector<2x256xf32> to vector<1x256xf32>
    %15 = vector.broadcast %14 : vector<1x256xf32> to vector<8x256xf32>
    %16 = arith.addf %13, %15 : vector<8x256xf32>
    %cst_11 = arith.constant 0.000000e+00 : f32
    %17 = vector.broadcast %cst_11 : f32 to vector<8x256xf32>
    %18 = arith.maximumf %16, %17 : vector<8x256xf32>
    %19 = arith.truncf %18 : vector<8x256xf32> to vector<8x256xbf16>
    %c0_12 = arith.constant 0 : index
    %c0_13 = arith.constant 0 : index
    %20 = vector.load %arg5[%c0_12, %c0_13] : memref<256x128xbf16, #tpu.memory_space<vmem>>, vector<256x128xbf16>
    %cst_14 = arith.constant dense<0.000000e+00> : vector<8x128xf32>
    %21 = tpu.matmul %19, %20, %cst_14 {dimension_numbers = #tpu.dot_dimension_numbers<[1], [0], [0], [1], [0, 0, 1, 1], [], []>} : vector<8x256xbf16>, vector<256x128xbf16>, vector<8x128xf32> -> vector<8x128xf32>
    %22 = vector.extract_strided_slice %3 {offsets = [0, 0], sizes = [1, 128], strides = [1, 1]} : vector<3x128xf32> to vector<1x128xf32>
    %23 = vector.broadcast %22 : vector<1x128xf32> to vector<8x128xf32>
    %24 = arith.addf %21, %23 : vector<8x128xf32>
    %25 = math.tanh %24 : vector<8x128xf32>
    %26 = vector.extract_strided_slice %3 {offsets = [1, 0], sizes = [1, 128], strides = [1, 1]} : vector<3x128xf32> to vector<1x128xf32>
    %27 = vector.broadcast %26 : vector<1x128xf32> to vector<8x128xf32>
    %28 = arith.mulf %25, %27 : vector<8x128xf32>
    %29 = vector.extract_strided_slice %3 {offsets = [2, 0], sizes = [1, 128], strides = [1, 1]} : vector<3x128xf32> to vector<1x128xf32>
    %30 = vector.broadcast %29 : vector<1x128xf32> to vector<8x128xf32>
    %31 = arith.addf %28, %30 : vector<8x128xf32>
    %32 = vector.extract_strided_slice %31 {offsets = [0, 0], sizes = [8, 4], strides = [1, 1]} : vector<8x128xf32> to vector<8x4xf32>
    %c0_15 = arith.constant 0 : index
    %c0_16 = arith.constant 0 : index
    %33 = vector.load %arg7[%c0_15, %c0_16] : memref<8x4xf32, #tpu.memory_space<vmem>>, vector<8x4xf32>
    tpu.vector_store %arg7[%c0_15, %c0_16], %32 {strides = array<i32>} : memref<8x4xf32, #tpu.memory_space<vmem>>, vector<8x4xf32>,
    return
  }
  func.func @transform_0(%arg0: i32) -> (i32, i32) {
    %c0_i32 = arith.constant 0 : i32
    %c0_i32_0 = arith.constant 0 : i32
    return %arg0, %c0_i32 : i32, i32
  }
  func.func @transform_1(%arg0: i32) -> (i32, i32) {
    %c0_i32 = arith.constant 0 : i32
    %c0_i32_0 = arith.constant 0 : i32
    %c0_i32_1 = arith.constant 0 : i32
    return %c0_i32, %c0_i32_0 : i32, i32
  }
  func.func @transform_2(%arg0: i32) -> (i32, i32) {
    %c0_i32 = arith.constant 0 : i32
    %c0_i32_0 = arith.constant 0 : i32
    %c0_i32_1 = arith.constant 0 : i32
    return %c0_i32, %c0_i32_0 : i32, i32
  }
  func.func @transform_3(%arg0: i32) -> (i32, i32) {
    %c0_i32 = arith.constant 0 : i32
    %c0_i32_0 = arith.constant 0 : i32
    %c0_i32_1 = arith.constant 0 : i32
    return %c0_i32, %c0_i32_0 : i32, i32
  }
  func.func @transform_4(%arg0: i32) -> (i32, i32) {
    %c0_i32 = arith.constant 0 : i32
    %c0_i32_0 = arith.constant 0 : i32
    %c0_i32_1 = arith.constant 0 : i32
    return %c0_i32, %c0_i32_0 : i32, i32
  }
  func.func @transform_5(%arg0: i32) -> (i32, i32) {
    %c0_i32 = arith.constant 0 : i32
    %c0_i32_0 = arith.constant 0 : i32
    %c0_i32_1 = arith.constant 0 : i32
    return %c0_i32, %c0_i32_0 : i32, i32
  }
  func.func @transform_6(%arg0: i32) -> (i32, i32) {
    %c0_i32 = arith.constant 0 : i32
    %c0_i32_0 = arith.constant 0 : i32
    return %arg0, %c0_i32 : i32, i32
  }
}

</mosaic_0001>

<bundles_post_ra>
// kernel: tpu_custom_call.1
= control target key start
LH: loop header
LB: loop body
LE: loop exit
PB: predicated region body
PF: predicated region fallthrough
CT: control target
= control target key end

     0   :  { %11 = vsyncpa [#allocation3], 0  ;;  %s1057_s0 = inlined_call_operand.hbm [shape: f32[8,128], index: 0, kind: input, shape index: {}]   ;;  %s1058_s1 = inlined_call_operand.hbm [shape: bf16[128,256], index: 1, kind: input, shape index: {}]   ;;  %s1059_s2 = inlined_call_operand.hbm [shape: f32[2,256], index: 2, kind: input, shape index: {}]   ;;  %s1060_s3 = inlined_call_operand.hbm [shape: bf16[256,256], index: 3, kind: input, shape index: {}]   ;;  %s1061_s4 = inlined_call_operand.hbm [shape: bf16[256,128], index: 4, kind: input, shape index: {}]   ;;  %s1062_s5 = inlined_call_operand.vmem [shape: f32[3,128], index: 5, kind: input, shape index: {}]   ;;  %s1063_s6 = inlined_call_operand.vmem [shape: f32[8,4], index: 6, kind: output, shape index: {}]  }
   0x1   :  { %12 = vsyncpa [#allocation5], 0 }
   0x2   :  { %13 = vsyncpa [#allocation8], 0  ;;  %s991_s21 = smov [#allocation4]  }
   0x3   :  { %s29_s22 = sshll.u32 %s991_s21, 4  ;;  %s30_s22 = int_to_ptr.vmem [resolvable:$true] %s29_s22 }
   0x4   :  { %s893_s23 = scalar_lea.vmem %s30_s22, 2048  ;;  %p898_p1 = scmp.lt.s32.totalorder %s30_s22, %s30_s22 }
   0x5   :  { %p894_p0 = scmp.ne.s32.totalorder %s30_s22, %s893_s23  ;;  %p899_p2 = scmp.lt.s32.totalorder %s893_s23, %s893_s23 }
   0x7   :  { %p900_p3 = por %p899_p2, %p898_p1 }
   0x9   :  { %p901_p4 = pnand %p900_p3, %p894_p0 }
   0xb   :  { %904 = shalt.err (!%p901_p4)
}
   0xc   :  { %s992_s24 = smov 128   ;;  %s993_s25 = smov 8  }
   0xd   :  { %35 = dma.hbm_to_vmem [thread:$0]  %s1058_s1, 2048, %s30_s22, [#allocation5], %s992_s24, %s992_s24, %s993_s25  }
   0xe   :  { %s994_s28 = smov [#allocation7]   ;;  %s995_s30 = smov [#allocation2]  }
   0xf   :  { %s51_s29 = sshll.u32 %s994_s28, 4  ;;  %s20_s7 = sshll.u32 %s995_s30, 4  ;;  %s52_s29 = int_to_ptr.vmem [resolvable:$true] %s51_s29  ;;  %s21_s7 = int_to_ptr.vmem [resolvable:$true] %s20_s7 }
  0x10   :  { %s913_s8 = scalar_lea.vmem %s52_s29, 4096  ;;  %p918_p6 = scmp.lt.s32.totalorder %s52_s29, %s52_s29 }
  0x11   :  { %p914_p5 = scmp.ne.s32.totalorder %s52_s29, %s913_s8  ;;  %p919_p7 = scmp.lt.s32.totalorder %s913_s8, %s913_s8 }
  0x13   :  { %p920_p8 = por %p919_p7, %p918_p6 }
  0x15   :  { %p921_p9 = pnand %p920_p8, %p914_p5 }
  0x17   :  { %924 = shalt.err (!%p921_p9)
}
  0x18   :  { %57 = dma.hbm_to_vmem [thread:$0]  %s1060_s3, 4096, %s52_s29, [#allocation8], %s992_s24, %s992_s24, %s993_s25  }
  0x19   :  { %s933_s11 = scalar_lea.vmem %s21_s7, 128  ;;  %p938_p11 = scmp.lt.s32.totalorder %s21_s7, %s21_s7 }
  0x1a   :  { %p934_p10 = scmp.ne.s32.totalorder %s21_s7, %s933_s11  ;;  %p939_p12 = scmp.lt.s32.totalorder %s933_s11, %s933_s11 }
  0x1c   :  { %p940_p13 = por %p939_p12, %p938_p11 }
  0x1e   :  { %p941_p0 = pnand %p940_p13, %p934_p10 }
  0x20   :  { %944 = shalt.err (!%p941_p0)
}
  0x21   :  { %23 = dma.hbm_to_vmem [thread:$0]  %s1057_s0, 128, %s21_s7, [#allocation3]  }
  0x22   :  { %s996_s13 = smov [#allocation6]   ;;  %s997_s15 = smov [#allocation9]  }
  0x23   :  { %s42_s14 = sshll.u32 %s996_s13, 4  ;;  %s63_s16 = sshll.u32 %s997_s15, 4  ;;  %s43_s14 = int_to_ptr.vmem [resolvable:$true] %s42_s14  ;;  %s64_s16 = int_to_ptr.vmem [resolvable:$true] %s63_s16 }
  0x24   :  { %s953_s17 = scalar_lea.vmem %s43_s14, 64  ;;  %p958_p2 = scmp.lt.s32.totalorder %s43_s14, %s43_s14 }
  0x25   :  { %p954_p1 = scmp.ne.s32.totalorder %s43_s14, %s953_s17  ;;  %p959_p3 = scmp.lt.s32.totalorder %s953_s17, %s953_s17 }
  0x27   :  { %p960_p4 = por %p959_p3, %p958_p2 }
  0x29   :  { %p961_p5 = pnand %p960_p4, %p954_p1 }
  0x2b   :  { %964 = shalt.err (!%p961_p5)
}
  0x2c   :  { %45 = dma.hbm_to_vmem [thread:$0]  %s1059_s2, 64, %s43_s14, [#allocation5]  }
  0x2d   :  { %s973_s19 = scalar_lea.vmem %s64_s16, 2048  ;;  %p978_p7 = scmp.lt.s32.totalorder %s64_s16, %s64_s16 }
  0x2e   :  { %p974_p6 = scmp.ne.s32.totalorder %s64_s16, %s973_s19  ;;  %p979_p8 = scmp.lt.s32.totalorder %s973_s19, %s973_s19 }
  0x30   :  { %p980_p9 = por %p979_p8, %p978_p7 }
  0x32   :  { %p981_p10 = pnand %p980_p9, %p974_p6 }
  0x34   :  { %984 = shalt.err (!%p981_p10)
}
  0x35   :  { %s998_s0 = smov 64   ;;  %s999_s20 = smov 4  }
  0x36   :  { %69 = dma.hbm_to_vmem [thread:$0]  %s1061_s4, 2048, %s64_s16, [#allocation8], %s998_s0, %s998_s0, %s999_s20  }
  0x37   :  { %985 = dma.done.wait [#allocation3], 128  }
  0x38   :  { %986 = vsyncadd [#allocation3], 4294967168 }
  0x39   :  { %987 = dma.done.wait [#allocation5], 2112  }
  0x3a   :  { %988 = vsyncadd [#allocation5], 4294965184 }
  0x3b   :  { %989 = dma.done.wait [#allocation8], 6144  }
  0x3c   :  { %990 = vsyncadd [#allocation8], 4294961152  ;;  %v1000_v0 = vmov 0   ;;  %v795_v1 = vld [vmem:[#allocation4 + $0x74] ss:$8 sps:$4 sm:$0xff]   ;;  %v871_v55 = vld [vmem:[#allocation9 + $0x68] sm:$0xff]   ;;  %v109_v63 = vlaneseq }
  0x3d   :  { %239 = vmatprep.mubr.bf16.mxu0 %v1000_v0  ;;  %v797_v2 = vld [vmem:[#allocation4 + $0x70] ss:$8 sps:$4 sm:$0xff]   ;;  %207 = vmatprep.subr.bf16.mxu0 %v795_v1  ;;  %v798_v3 = vld [vmem:[#allocation4 + $0x64] ss:$8 sps:$4 sm:$0xff]   ;;  %v800_v4 = vld [vmem:[#allocation4 + $0x60] ss:$8 sps:$4 sm:$0xff]  }
  0x3e   :  { %208 = vmatpush1.bf16.msra.mxu0 %v797_v2  ;;  %v801_v5 = vld [vmem:[#allocation4 + $0x54] ss:$8 sps:$4 sm:$0xff]   ;;  %v803_v6 = vld [vmem:[#allocation4 + $0x50] ss:$8 sps:$4 sm:$0xff]   ;;  %v804_v7 = vld [vmem:[#allocation4 + $0x44] ss:$8 sps:$4 sm:$0xff]  }
  0x3f   :  { %209 = vmatprep.subr.bf16.mxu0 %v798_v3  ;;  %v806_v8 = vld [vmem:[#allocation4 + $0x40] ss:$8 sps:$4 sm:$0xff]   ;;  %v807_v9 = vld [vmem:[#allocation4 + $0x34] ss:$8 sps:$4 sm:$0xff]   ;;  %v809_v13 = vld [vmem:[#allocation4 + $0x30] ss:$8 sps:$4 sm:$0xff]  }
  0x40   :  { %v819_v10 = vld [vmem:[#allocation7 + $0x74] ss:$8 sps:$4 sm:$0xff]   ;;  %v821_v11 = vld [vmem:[#allocation7 + $0x70] ss:$8 sps:$4 sm:$0xff]   ;;  %v822_v12 = vld [vmem:[#allocation7 + $0x64] ss:$8 sps:$4 sm:$0xff]  }
  0x41   :  { %462 = vmatprep.subr.bf16.mxu1 %v819_v10  ;;  %v824_v14 = vld [vmem:[#allocation7 + $0x60] ss:$8 sps:$4 sm:$0xff]   ;;  %v825_v15 = vld [vmem:[#allocation7 + $0x54] ss:$8 sps:$4 sm:$0xff]   ;;  %v827_v18 = vld [vmem:[#allocation7 + $0x50] ss:$8 sps:$4 sm:$0xff]  }
  0x42   :  { %210 = vmatpush1.bf16.msra.mxu0 %v800_v4  ;;  %463 = vmatpush1.bf16.msra.mxu1 %v821_v11  ;;  %v810_v16 = vld [vmem:[#allocation4 + $0x24] ss:$8 sps:$4 sm:$0xff]   ;;  %v812_v17 = vld [vmem:[#allocation4 + $0x20] ss:$8 sps:$4 sm:$0xff]   ;;  %v813_v20 = vld [vmem:[#allocation4 + $0x14] ss:$8 sps:$4 sm:$0xff]  }
  0x43   :  { %211 = vmatprep.subr.bf16.mxu0 %v801_v5  ;;  %464 = vmatprep.subr.bf16.mxu1 %v822_v12  ;;  %v828_v19 = vld [vmem:[#allocation7 + $0x44] ss:$8 sps:$4 sm:$0xff]   ;;  %v830_v22 = vld [vmem:[#allocation7 + $0x40] ss:$8 sps:$4 sm:$0xff]   ;;  %v831_v23 = vld [vmem:[#allocation7 + $0x34] ss:$8 sps:$4 sm:$0xff]  }
  0x44   :  { %v815_v21 = vld [vmem:[#allocation4 + $0x10] ss:$8 sps:$4 sm:$0xff]   ;;  %v816_v24 = vld [vmem:[#allocation4 + $0x4] ss:$8 sps:$4 sm:$0xff]   ;;  %v818_v25 = vld [vmem:[#allocation4] ss:$8 sps:$4 sm:$0xff]  }
  0x45   :  { %v88_v26 = vld [vmem:[#allocation2] sm:$0xff]  ;;  %v834_v28 = vld [vmem:[#allocation7 + $0x24] ss:$8 sps:$4 sm:$0xff]   ;;  %v836_v29 = vld [vmem:[#allocation7 + $0x20] ss:$8 sps:$4 sm:$0xff]   ;;  %v110_v0 = vshrl.u32 %v109_v63, 7 }
  0x46   :  { %212 = vmatpush1.bf16.msra.mxu0 %v803_v6  ;;  %465 = vmatpush1.bf16.msra.mxu1 %v824_v14  ;;  %v833_v27 = vld [vmem:[#allocation7 + $0x30] ss:$8 sps:$4 sm:$0xff]   ;;  %v837_v30 = vld [vmem:[#allocation7 + $0x14] ss:$8 sps:$4 sm:$0xff]   ;;  %v89_v31 = vpack.c.bf16 %v88_v26, %v88_v26  ;;  %v840_v33 = vld [vmem:[#allocation7 + $0x4] ss:$8 sps:$4 sm:$0xff]  }
  0x47   :  { %213 = vmatprep.subr.bf16.mxu0 %v804_v7  ;;  %466 = vmatprep.subr.bf16.mxu1 %v825_v15  ;;  %v839_v32 = vld [vmem:[#allocation7 + $0x10] ss:$8 sps:$4 sm:$0xff]   ;;  %v842_v34 = vld [vmem:[#allocation7] ss:$8 sps:$4 sm:$0xff]   ;;  %v843_v35 = vld [vmem:[#allocation7 + $0xf4] ss:$8 sps:$4 sm:$0xff]  }
  0x48   :  { %v845_v36 = vld [vmem:[#allocation7 + $0xf0] ss:$8 sps:$4 sm:$0xff]   ;;  %v846_v37 = vld [vmem:[#allocation7 + $0xe4] ss:$8 sps:$4 sm:$0xff]   ;;  %v848_v38 = vld [vmem:[#allocation7 + $0xe0] ss:$8 sps:$4 sm:$0xff]  }
  0x49   :  { %v849_v39 = vld [vmem:[#allocation7 + $0xd4] ss:$8 sps:$4 sm:$0xff]   ;;  %v851_v40 = vld [vmem:[#allocation7 + $0xd0] ss:$8 sps:$4 sm:$0xff]   ;;  %v852_v41 = vld [vmem:[#allocation7 + $0xc4] ss:$8 sps:$4 sm:$0xff]  }
  0x4a   :  { %214 = vmatpush1.bf16.msra.mxu0 %v806_v8  ;;  %467 = vmatpush1.bf16.msra.mxu1 %v827_v18  ;;  %v854_v42 = vld [vmem:[#allocation7 + $0xc0] ss:$8 sps:$4 sm:$0xff]   ;;  %v855_v43 = vld [vmem:[#allocation7 + $0xb4] ss:$8 sps:$4 sm:$0xff]   ;;  %v857_v44 = vld [vmem:[#allocation7 + $0xb0] ss:$8 sps:$4 sm:$0xff]  }
  0x4b   :  { %215 = vmatprep.subr.bf16.mxu0 %v807_v9  ;;  %468 = vmatprep.subr.bf16.mxu1 %v828_v19  ;;  %v858_v45 = vld [vmem:[#allocation7 + $0xa4] ss:$8 sps:$4 sm:$0xff]   ;;  %v860_v46 = vld [vmem:[#allocation7 + $0xa0] ss:$8 sps:$4 sm:$0xff]   ;;  %v861_v47 = vld [vmem:[#allocation7 + $0x94] ss:$8 sps:$4 sm:$0xff]  }
  0x4c   :  { %v863_v48 = vld [vmem:[#allocation7 + $0x90] ss:$8 sps:$4 sm:$0xff]   ;;  %v864_v49 = vld [vmem:[#allocation7 + $0x84] ss:$8 sps:$4 sm:$0xff]   ;;  %v866_v50 = vld [vmem:[#allocation7 + $0x80] ss:$8 sps:$4 sm:$0xff]  }
  0x4d   :  { %v867_v51 = vld [vmem:[#allocation9 + $0x78] sm:$0xff]   ;;  %v869_v53 = vld [vmem:[#allocation9 + $0x70] sm:$0xff]   ;;  %v872_v56 = vld [vmem:[#allocation9 + $0x28] sm:$0xff]   ;;  %v111_v1 = vsub.s32 0, %v110_v0  ;;  %v115_v3 = vsub.s32 2, %v110_v0  ;;  %vm690_vm0 = vcmask 31744  }
  0x4e   :  { %216 = vmatpush1.bf16.msra.mxu0 %v809_v13  ;;  %469 = vmatpush1.bf16.msra.mxu1 %v830_v22  ;;  %v868_v52 = vld [vmem:[#allocation9 + $0x38] sm:$0xff]   ;;  %v870_v54 = vld [vmem:[#allocation9 + $0x30] sm:$0xff]   ;;  %v873_v57 = vld [vmem:[#allocation9 + $0x60] sm:$0xff]   ;;  %v286_v22 = vsub.s32 1, %v110_v0 }
  0x4f   :  { %217 = vmatprep.subr.bf16.mxu0 %v810_v16  ;;  %470 = vmatprep.subr.bf16.mxu1 %v831_v23  ;;  %v874_v58 = vld [vmem:[#allocation9 + $0x20] sm:$0xff]   ;;  %v875_v59 = vld [vmem:[#allocation9 + $0x58] sm:$0xff]   ;;  %v877_v61 = vld [vmem:[#allocation9 + $0x50] sm:$0xff]   ;;  %v290_v23 = vsub.s32 3, %v110_v0 }
  0x50   :  { %v876_v60 = vld [vmem:[#allocation9 + $0x18] sm:$0xff]   ;;  %v878_v62 = vld [vmem:[#allocation9 + $0x10] sm:$0xff]   ;;  %v879_v18 = vld [vmem:[#allocation9 + $0x48] sm:$0xff]  }
  0x51   :  { %v90_v2 = vld [vmem:[#allocation6] sm:$0xf]  ;;  %v880_v19 = vld [vmem:[#allocation9 + $0x8] sm:$0xff]  }
  0x52   :  { %218 = vmatpush1.bf16.msra.mxu0 %v812_v17  ;;  %471 = vmatpush1.bf16.msra.mxu1 %v833_v27  ;;  %v112_v4 = vrot.slane %v90_v2, %v111_v1  ;;  %v116_v5 = vrot.slane %v90_v2, %v115_v3 }
  0x53   :  { %219 = vmatprep.subr.bf16.mxu0 %v813_v20  ;;  %472 = vmatprep.subr.bf16.mxu1 %v834_v28  ;;  %v881_v20 = vld [vmem:[#allocation9 + $0x40] sm:$0xff]  }
  0x54   :  { %v122_v6 = vrot.slane %v112_v4, %v111_v1  ;;  %v126_v7 = vrot.slane %v116_v5, %v111_v1 }
  0x56   :  { %220 = vmatpush1.bf16.msra.mxu0 %v815_v21  ;;  %473 = vmatpush1.bf16.msra.mxu1 %v836_v29  ;;  %v882_v21 = vld [vmem:[#allocation9] sm:$0xff]  }
  0x57   :  { %221 = vmatprep.subr.bf16.mxu0 %v816_v24  ;;  %474 = vmatprep.subr.bf16.mxu1 %v837_v30  ;;  %v287_v24 = vrot.slane %v90_v2, %v286_v22 }
  0x59   :  { %v297_v26 = vrot.slane %v287_v24, %v286_v22 }
  0x5a   :  { %222 = vmatpush1.bf16.msra.mxu0 %v818_v25  ;;  %475 = vmatpush1.bf16.msra.mxu1 %v839_v32  ;;  %v291_v25 = vrot.slane %v90_v2, %v290_v23 }
  0x5b   :  { %476 = vmatprep.subr.bf16.mxu1 %v840_v33  ;;  %763 = vmatprep.subr.bf16.mxu0 %v867_v51 }
  0x5c   :  { %v301_v27 = vrot.slane %v291_v25, %v286_v22 }
  0x5d   :  { %240 = vmatmul.mubr.bf16.vlgmr.msra.gmra.mxu0 %v89_v31 }
  0x5e   :  { %477 = vmatpush1.bf16.msra.mxu1 %v842_v34  ;;  %764 = vmatpush3.bf16.msra.mxu0 %v868_v52 }
  0x5f   :  { %478 = vmatprep.subr.bf16.mxu1 %v843_v35  ;;  %765 = vmatprep.subr.bf16.mxu0 %v869_v53 }
  0x62   :  { %479 = vmatpush2.bf16.msra.mxu1 %v845_v36  ;;  %766 = vmatpush3.bf16.msra.mxu0 %v870_v54 }
  0x63   :  { %480 = vmatprep.subr.bf16.mxu1 %v846_v37  ;;  %767 = vmatprep.subr.bf16.mxu0 %v871_v55 }
  0x66   :  { %481 = vmatpush2.bf16.msra.mxu1 %v848_v38  ;;  %768 = vmatpush3.bf16.msra.mxu0 %v872_v56  ;;  %v91_v38 = vld [vmem:[%s1062_s5] sm:$0x7] }
  0x67   :  { %482 = vmatprep.subr.bf16.mxu1 %v849_v39  ;;  %769 = vmatprep.subr.bf16.mxu0 %v873_v57 }
  0x6a   :  { %483 = vmatpush2.bf16.msra.mxu1 %v851_v40  ;;  %770 = vmatpush3.bf16.msra.mxu0 %v874_v58  ;;  %v542_v40 = vrot.slane %v91_v38, %v111_v1 }
  0x6b   :  { %484 = vmatprep.subr.bf16.mxu1 %v852_v41  ;;  %771 = vmatprep.subr.bf16.mxu0 %v875_v59 }
  0x6e   :  { %485 = vmatpush2.bf16.msra.mxu1 %v854_v42  ;;  %772 = vmatpush3.bf16.msra.mxu0 %v876_v60 }
  0x6f   :  { %486 = vmatprep.subr.bf16.mxu1 %v855_v43  ;;  %773 = vmatprep.subr.bf16.mxu0 %v877_v61 }
  0x72   :  { %487 = vmatpush2.bf16.msra.mxu1 %v857_v44  ;;  %774 = vmatpush3.bf16.msra.mxu0 %v878_v62 }
  0x73   :  { %488 = vmatprep.subr.bf16.mxu1 %v858_v45  ;;  %775 = vmatprep.subr.bf16.mxu0 %v879_v18 }
  0x76   :  { %489 = vmatpush2.bf16.msra.mxu1 %v860_v46  ;;  %776 = vmatpush3.bf16.msra.mxu0 %v880_v19  ;;  %v683_v46 = vrot.slane %v91_v38, %v286_v22 }
  0x77   :  { %490 = vmatprep.subr.bf16.mxu1 %v861_v47  ;;  %777 = vmatprep.subr.bf16.mxu0 %v881_v20  ;;  %v688_v47 = vrot.slane %v91_v38, %v115_v3 }
  0x7a   :  { %491 = vmatpush2.bf16.msra.mxu1 %v863_v48  ;;  %778 = vmatpush3.bf16.msra.mxu0 %v882_v21 }
  0x7b   :  { %492 = vmatprep.subr.bf16.mxu1 %v864_v49 }
  0x7e   :  { %493 = vmatpush2.bf16.msra.mxu1 %v866_v50 }
 0x11d   :  { %v241_v8 = vpop.f32.mrf.mxu0 }
 0x11e   :  { %v242_v9 = vadd.f32 %v241_v8, %v122_v6 }
 0x11f   :  { %v243_v10 = vpop.f32.mrf.mxu0 }
 0x120   :  { %v244_v11 = vadd.f32 %v243_v10, %v126_v7  ;;  %v248_v12 = vmax.f32 %v242_v9, 0.0 }
 0x121   :  { %v245_v13 = vpop.f32.mrf.mxu0 }
 0x122   :  { %v249_v14 = vmax.f32 %v244_v11, 0.0  ;;  %v250_v17 = vpack.c.bf16 %v248_v12, %v248_v12 }
 0x123   :  { %v246_v15 = vpop.f32.mrf.mxu0 }
 0x124   :  { %v251_v16 = vpack.c.bf16 %v249_v14, %v249_v14 }
 0x126   :  { %494 = vmatprep.mubr.bf16.mxu1 %v251_v16 }
 0x127   :  { %495 = vmatmul.mubr.bf16.vlgmr.msra.gmra.mxu1 %v250_v17 }
 0x1e7   :  { %v496_v28 = vpop.f32.mrf.mxu1 }
 0x1e8   :  { %v497_v29 = vadd.f32 %v496_v28, %v297_v26 }
 0x1e9   :  { %v498_v30 = vpop.f32.mrf.mxu1 }
 0x1ea   :  { %v499_v31 = vadd.f32 %v498_v30, %v301_v27  ;;  %v503_v32 = vmax.f32 %v497_v29, 0.0 }
 0x1eb   :  { %v500_v33 = vpop.f32.mrf.mxu1 }
 0x1ec   :  { %v504_v34 = vmax.f32 %v499_v31, 0.0  ;;  %v505_v37 = vpack.c.bf16 %v503_v32, %v503_v32 }
 0x1ed   :  { %v501_v35 = vpop.f32.mrf.mxu1 }
 0x1ee   :  { %v506_v36 = vpack.c.bf16 %v504_v34, %v504_v34 }
 0x1f0   :  { %671 = vmatprep.mubr.bf16.mxu0 %v506_v36 }
 0x1f1   :  { %672 = vmatmul.mubr.bf16.vlgmr.msra.gmra.mxu0 %v505_v37 }
 0x2b1   :  { %v779_v39 = vpop.f32.mrf.mxu0 }
 0x2b3   :  { %v780_v41 = vpop.f32.mrf.mxu0 }
 0x2b4   :  { %v781_v42 = vadd.f32 %v780_v41, %v779_v39 }
 0x2b5   :  { %v782_v43 = vpop.f32.mrf.mxu0 }
 0x2b6   :  { %v674_v44 = vadd.f32 %v781_v42, %v542_v40 }
 0x2b7   :  { %v783_v45 = vpop.f32.mrf.mxu0 }
 0x2b8   :  { %883 = vtanh.f32 %v674_v44 }
 0x2c5   :  { %v884_v48 = vpop.eup %883 }
 0x2c6   :  { %v684_v49 = vmul.f32 %v884_v48, %v683_v46 }
 0x2c8   :  { %v689_v50 = vadd.f32 %v688_v47, %v684_v49 }
 0x2ca   :  { %691 = vst.msk [vmem:[%s1063_s6] sm:$0xff] %vm690_vm0, %v689_v50 }
 0x2cb   :  { %696 = vsyncpa [#allocation3], 1 }
 0x2cc   :  { %697 = vsyncpa [#allocation5], 1 }
 0x2cd   :  { %698 = vsyncpa [#allocation8], 1 }

</bundles_post_ra>
